<compile_context>
chip_gen: v7x
topology: tpu7x:2x2x1
jax: 0.10.0
libtpu: 0.0.40
codegen_flags: <defaults>
</compile_context>

<pallas_src>
import jax
import jax.numpy as jnp
from jax.experimental import pallas as pl
from jax.experimental.pallas import tpu as pltpu


_LANE_CAP = 256 * 1024     # max lanes (samples) per grid step (~8 MiB dbl-buffered)
_LANE_QUANTUM = 1024       # 8 sublane rows x 128 lanes -> dense (8,128) vreg tiles


def _round_up(a, m):
    return ((a + m - 1) // m) * m


def _choose_tiling(n):
    """Pick (tile_lanes, padded_n, grid_len) for n samples."""
    nq = _round_up(max(int(n), 1), _LANE_QUANTUM)
    num_tiles = _round_up(nq, _LANE_CAP) // _LANE_CAP
    if nq >= 2 * _LANE_QUANTUM:
        num_tiles = max(num_tiles, 2)          # v7x megacore: keep both TCs busy
    tn = _round_up(-(-nq // num_tiles), _LANE_QUANTUM)
    grid = -(-nq // tn)
    return tn, grid * tn, grid


def _fused_kernel(w_ref, b_ref, x_ref, o_ref):
    # w_ref: (Cin,) f32 SMEM      -- fused weights  Wt @ Wfc^T
    # b_ref: (1,)   f32 SMEM      -- Linear bias
    # x_ref: (Cin, TR, 128) VMEM  -- dense tile, sample s = r*128 + lane
    # o_ref: (TR, 128) VMEM       -- dense output tile
    cin = x_ref.shape[0]
    acc = x_ref[0] * w_ref[0]                  # (TR,128), scalar*vector on VPU
    for c in range(1, cin):                    # Cin is tiny & static: unrolled
        acc = acc + x_ref[c] * w_ref[c]
    o_ref[...] = acc + b_ref[0]


def _fused_channel_mix(x_cn, w_fused, bias):
    """x_cn: (Cin, N) f32 channel-major activations. Returns (N,) f32."""
    cin, n = x_cn.shape
    tn, n_pad, grid = _choose_tiling(n)
    if n_pad != n:
        x_cn = jnp.pad(x_cn, ((0, 0), (0, n_pad - n)))
    n_rows = n_pad // 128
    tr = tn // 128                              # multiple of 8 by construction
    x3 = x_cn.reshape(cin, n_rows, 128)         # free reshape (row-major split)

    out = pl.pallas_call(
        _fused_kernel,
        out_shape=jax.ShapeDtypeStruct((n_rows, 128), jnp.float32),
        grid=(grid,),
        in_specs=[
            pl.BlockSpec(memory_space=pltpu.MemorySpace.SMEM),      # w_fused
            pl.BlockSpec(memory_space=pltpu.MemorySpace.SMEM),      # bias
            pl.BlockSpec((cin, tr, 128), lambda i: (0, i, 0)),      # x tile
        ],
        out_specs=pl.BlockSpec((tr, 128), lambda i: (i, 0)),
        compiler_params=pltpu.CompilerParams(
            dimension_semantics=("parallel",),
        ),
        cost_estimate=pl.CostEstimate(
            flops=2 * n_pad * cin,
            transcendentals=0,
            bytes_accessed=(cin + 1) * n_pad * 4,
        ),
    )(w_fused, bias, x3)

    return out.reshape(n_pad)[:n]               # free reshape + slice


def model_forward(x_nchw, conv_t_weight, fc_weight, fc_bias):
    """x_nchw: (N, 3, 1, 1); conv_t_weight: (3, 12, 1, 1) (ConvTranspose2d
    layout = (in_ch, out_ch, kH, kW)); fc_weight: (1, 12); fc_bias: (1,)."""
    n, cin, h, w = x_nchw.shape
    # TODO(synk): Linear(12,1) on flatten(1) only type-checks for 1x1 spatial;
    # the module's advertised example input (2,3,10,20) is itself shape-invalid.
    assert h == 1 and w == 1, "Linear(12,1) on flatten(1) requires 1x1 spatial"
    cout = conv_t_weight.shape[1]

    # Algebraic fold of the two weight matrices (tiny, plain JAX).
    wt2d = conv_t_weight.reshape(cin, cout).astype(jnp.float32)     # (Cin, Cout)
    w_fused = (wt2d @ fc_weight.astype(jnp.float32).T).reshape(cin) # (Cin,)
    b = fc_bias.astype(jnp.float32).reshape(1)

    # Channel-major layout for lane/sublane-dense kernel tiles.
    xt = x_nchw.reshape(n, cin).astype(jnp.float32).T               # (Cin, N)
    y = _fused_channel_mix(xt, w_fused, b)                          # (N,)
    return y.reshape(n, 1)


if __name__ == "__main__":
    key = jax.random.PRNGKey(0)
    k_x, k_wt, k_wfc, k_b = jax.random.split(key, 4)

    N, CIN, COUT = 2, 3, 12
    x = jax.random.normal(k_x, (N, CIN, 1, 1), dtype=jnp.float32)
    conv_t_weight = jax.random.normal(k_wt, (CIN, COUT, 1, 1), dtype=jnp.float32) * 0.5
    fc_weight = jax.random.normal(k_wfc, (1, COUT), dtype=jnp.float32) * (1.0 / jnp.sqrt(COUT))
    fc_bias = jax.random.normal(k_b, (1,), dtype=jnp.float32) * 0.1

    # Pure-JAX reference (mirrors the PyTorch forward).
    def reference(xin):
        x1 = jnp.einsum("nihw,iohw->nohw", xin, conv_t_weight)       # (N,12,1,1)
        return x1.reshape(xin.shape[0], -1) @ fc_weight.T + fc_bias  # (N,1)

    y = model_forward(x, conv_t_weight, fc_weight, fc_bias)
    jax.block_until_ready(y)
    assert jnp.allclose(y, reference(x), atol=1e-4, rtol=1e-4), (y, reference(x))

    # Second check with a batch large enough to exercise the multi-tile grid
    # (grid >= 2) path while staying small/fast.
    N2 = 4096
    x2 = jax.random.normal(jax.random.PRNGKey(1), (N2, CIN, 1, 1), dtype=jnp.float32)
    y2 = model_forward(x2, conv_t_weight, fc_weight, fc_bias)
    jax.block_until_ready(y2)
    assert jnp.allclose(y2, reference(x2), atol=1e-4, rtol=1e-4)

    print("KERNEL_OK")
</pallas_src>

<mosaic_0001>
module attributes {stable_mosaic.version = 11 : i64} {
  func.func @_fused_kernel(%arg0: i32, %arg1: memref<3xf32, #tpu.memory_space<smem>>, %arg2: memref<1xf32, #tpu.memory_space<smem>>, %arg3: memref<3x8x128xf32, #tpu.memory_space<vmem>>, %arg4: memref<8x128xf32, #tpu.memory_space<vmem>>) attributes {dimension_semantics = [#tpu.dimension_semantics<parallel>], iteration_bounds = array<i64: 1>, scalar_prefetch = 0 : i64, scratch_operands = 0 : i64, tpu.core_type = #tpu.core_type<tc>, window_params = [{transform_indices = @transform_0, window_bounds = array<i64: 3>}, {transform_indices = @transform_1, window_bounds = array<i64: 1>}, {transform_indices = @transform_2, window_bounds = array<i64: 3, 8, 128>}, {transform_indices = @transform_3, window_bounds = array<i64: 8, 128>}]} {
    %c0 = arith.constant 0 : index
    %c0_0 = arith.constant 0 : index
    %c0_1 = arith.constant 0 : index
    %0 = vector.load %arg3[%c0, %c0_0, %c0_1] : memref<3x8x128xf32, #tpu.memory_space<vmem>>, vector<1x8x128xf32>
    %1 = vector.shape_cast %0 : vector<1x8x128xf32> to vector<8x128xf32>
    %c0_2 = arith.constant 0 : index
    %2 = memref.load %arg1[%c0_2] : memref<3xf32, #tpu.memory_space<smem>>
    %3 = vector.broadcast %2 : f32 to vector<8x128xf32>
    %4 = arith.mulf %1, %3 : vector<8x128xf32>
    %c1 = arith.constant 1 : index
    %c0_3 = arith.constant 0 : index
    %c0_4 = arith.constant 0 : index
    %5 = vector.load %arg3[%c1, %c0_3, %c0_4] : memref<3x8x128xf32, #tpu.memory_space<vmem>>, vector<1x8x128xf32>
    %6 = vector.shape_cast %5 : vector<1x8x128xf32> to vector<8x128xf32>
    %c1_5 = arith.constant 1 : index
    %7 = memref.load %arg1[%c1_5] : memref<3xf32, #tpu.memory_space<smem>>
    %8 = vector.broadcast %7 : f32 to vector<8x128xf32>
    %9 = arith.mulf %6, %8 : vector<8x128xf32>
    %10 = arith.addf %4, %9 : vector<8x128xf32>
    %c2 = arith.constant 2 : index
    %c0_6 = arith.constant 0 : index
    %c0_7 = arith.constant 0 : index
    %11 = vector.load %arg3[%c2, %c0_6, %c0_7] : memref<3x8x128xf32, #tpu.memory_space<vmem>>, vector<1x8x128xf32>
    %12 = vector.shape_cast %11 : vector<1x8x128xf32> to vector<8x128xf32>
    %c2_8 = arith.constant 2 : index
    %13 = memref.load %arg1[%c2_8] : memref<3xf32, #tpu.memory_space<smem>>
    %14 = vector.broadcast %13 : f32 to vector<8x128xf32>
    %15 = arith.mulf %12, %14 : vector<8x128xf32>
    %16 = arith.addf %10, %15 : vector<8x128xf32>
    %c0_9 = arith.constant 0 : index
    %17 = memref.load %arg2[%c0_9] : memref<1xf32, #tpu.memory_space<smem>>
    %18 = vector.broadcast %17 : f32 to vector<8x128xf32>
    %19 = arith.addf %16, %18 : vector<8x128xf32>
    %c0_10 = arith.constant 0 : index
    %c0_11 = arith.constant 0 : index
    %20 = vector.load %arg4[%c0_10, %c0_11] : memref<8x128xf32, #tpu.memory_space<vmem>>, vector<8x128xf32>
    tpu.vector_store %arg4[%c0_10, %c0_11], %19 {strides = array<i32>} : memref<8x128xf32, #tpu.memory_space<vmem>>, vector<8x128xf32>,
    return
  }
  func.func @transform_0(%arg0: i32) -> i32 {
    %c0_i32 = arith.constant 0 : i32
    %c0_i32_0 = arith.constant 0 : i32
    return %c0_i32 : i32
  }
  func.func @transform_1(%arg0: i32) -> i32 {
    %c0_i32 = arith.constant 0 : i32
    %c0_i32_0 = arith.constant 0 : i32
    return %c0_i32 : i32
  }
  func.func @transform_2(%arg0: i32) -> (i32, i32, i32) {
    %c0_i32 = arith.constant 0 : i32
    %c0_i32_0 = arith.constant 0 : i32
    %c0_i32_1 = arith.constant 0 : i32
    return %c0_i32, %arg0, %c0_i32_0 : i32, i32, i32
  }
  func.func @transform_3(%arg0: i32) -> (i32, i32) {
    %c0_i32 = arith.constant 0 : i32
    %c0_i32_0 = arith.constant 0 : i32
    return %arg0, %c0_i32 : i32, i32
  }
}

</mosaic_0001>

<bundles_post_ra>
// kernel: tpu_custom_call.1
= control target key start
LH: loop header
LB: loop body
LE: loop exit
PB: predicated region body
PF: predicated region fallthrough
CT: control target
= control target key end

     0   :  { %9 = vsyncpa [#allocation6], 0  ;;  %s203_s0 = inlined_call_operand.vmem [shape: f32[3], index: 0, kind: input, shape index: {}]   ;;  %s204_s1 = inlined_call_operand.<no memory space> [shape: f32[1], index: 1, kind: input, shape index: {}]   ;;  %s205_s2 = inlined_call_operand.hbm [shape: f32[3,8,128], index: 2, kind: input, shape index: {}]   ;;  %s206_s3 = inlined_call_operand.hbm [shape: f32[8,128], index: 3, kind: output, shape index: {}]  }
   0x1   :  { %10 = vsyncpa [#allocation4], 0 }
   0x2   :  { %11 = vsyncpa [#allocation5], 0  ;;  %s18_s14 = sshll.u32 %s203_s0, 4  ;;  %s19_s14 = int_to_ptr.vmem [resolvable:$true] %s18_s14 }
   0x3   :  { %s86_s15 = scalar_lea.vmem %s19_s14, 16  ;;  %p91_p1 = scmp.lt.s32.totalorder %s19_s14, %s19_s14 }
   0x4   :  { %p87_p0 = scmp.ne.s32.totalorder %s19_s14, %s86_s15  ;;  %p92_p2 = scmp.lt.s32.totalorder %s86_s15, %s86_s15 }
   0x6   :  { %p93_p3 = por %p92_p2, %p91_p1 }
   0x8   :  { %p94_p4 = pnand %p93_p3, %p87_p0 }
   0xa   :  { %97 = shalt.err (!%p94_p4)
}
   0xb   :  { %s148_s16 = smov [#allocation3]   ;;  %s149_s17 = smov [#allocation7]  }
   0xc   :  { %21 = dma.vmem_to_smem %s19_s14, 16, %s148_s16, [#allocation6]  }
   0xd   :  { %s29_s18 = sshll.u32 %s149_s17, 4  ;;  %s98_s21 = scalar_lea.hbm %s205_s2, 384  ;;  %s30_s18 = int_to_ptr.vmem [resolvable:$true] %s29_s18 }
   0xe   :  { %p99_p5 = scmp.ne.s32.totalorder %s205_s2, %s98_s21  ;;  %p102_p6 = scmp.lt.u32.totalorder %s98_s21, %s205_s2 }
  0x10   :  { %p104_p7 = pnand %p102_p6, %p99_p5 }
  0x12   :  { %107 = shalt.err (!%p104_p7)
}
  0x13   :  { %s108_s25 = scalar_lea.vmem %s30_s18, 384  ;;  %p113_p9 = scmp.lt.s32.totalorder %s30_s18, %s30_s18 }
  0x14   :  { %p109_p8 = scmp.ne.s32.totalorder %s30_s18, %s108_s25  ;;  %p114_p10 = scmp.lt.s32.totalorder %s108_s25, %s108_s25 }
  0x16   :  { %p115_p11 = por %p114_p10, %p113_p9 }
  0x18   :  { %p116_p12 = pnand %p115_p11, %p109_p8 }
  0x1a   :  { %119 = shalt.err (!%p116_p12)
}
  0x1b   :  { %s150_s26 = smov 128   ;;  %s151_s27 = smov 8  }
  0x1c   :  { %35 = dma.hbm_to_vmem [thread:$0]  %s205_s2, 384, %s30_s18, [#allocation4], %s150_s26, %s150_s26, %s151_s27  }
  0x1d   :  { %142 = dma.done.wait [#allocation6], 16  }
  0x1e   :  { %143 = vsyncadd [#allocation6], 4294967280 }
  0x1f   :  { %144 = dma.done.wait [#allocation4], 384  }
  0x20   :  { %145 = vsyncadd [#allocation4], 4294966912 }
  0x21   :  { %42 = sfence }
  0x22   :  { %s44_s30 = sld [smem:[#allocation3]]  ;;  %s79_s4 = sld [smem:[#allocation3 + $0x1]]  ;;  %v43_v0 = vld [vmem:[#allocation7] sm:$0xff]  ;;  %v48_v1 = vld [vmem:[#allocation7 + $0x8] sm:$0xff]  ;;  %v54_v2 = vld [vmem:[#allocation7 + $0x10] sm:$0xff]  ;;  %v60_v10 = vstv %s204_s1 }
  0x23   :  { %s80_s5 = sld [smem:[#allocation3 + $0x2]]  ;;  %s152_s7 = smov [#allocation8]  }
  0x24   :  { %s69_s8 = sshll.u32 %s152_s7, 4  ;;  %s70_s8 = int_to_ptr.vmem [resolvable:$true] %s69_s8 }
  0x25   :  { %s120_s9 = scalar_lea.vmem %s70_s8, 128  ;;  %p125_p0 = scmp.lt.s32.totalorder %s70_s8, %s70_s8 }
  0x26   :  { %p121_p13 = scmp.ne.s32.totalorder %s70_s8, %s120_s9  ;;  %p126_p1 = scmp.lt.s32.totalorder %s120_s9, %s120_s9 }
  0x28   :  { %v45_v3 = vstv %s44_s30  ;;  %v50_v4 = vstv %s79_s4  ;;  %p127_p2 = por %p126_p1, %p125_p0 }
  0x29   :  { %v46_v5 = vmul.f32 %v45_v3, %v43_v0  ;;  %v51_v6 = vmul.f32 %v50_v4, %v48_v1  ;;  %v56_v7 = vstv %s80_s5 }
  0x2a   :  { %v57_v8 = vmul.f32 %v56_v7, %v54_v2  ;;  %p128_p3 = pnand %p127_p2, %p121_p13 }
  0x2b   :  { %v52_v9 = vadd.f32 %v51_v6, %v46_v5 }
  0x2d   :  { %v58_v11 = vadd.f32 %v57_v8, %v52_v9 }
  0x2f   :  { %v61_v12 = vadd.f32 %v60_v10, %v58_v11 }
  0x31   :  { %62 = vst [vmem:[#allocation8] sm:$0xff] %v61_v12 }
  0x32   :  { %131 = shalt.err (!%p128_p3)
}
  0x33   :  { %s132_s12 = scalar_lea.hbm %s206_s3, 128 }
  0x34   :  { %p133_p4 = scmp.ne.s32.totalorder %s206_s3, %s132_s12  ;;  %p136_p5 = scmp.lt.u32.totalorder %s132_s12, %s206_s3 }
  0x36   :  { %p138_p6 = pnand %p136_p5, %p133_p4 }
  0x38   :  { %141 = shalt.err (!%p138_p6)
}
  0x39   :  { %72 = dma.vmem_to_hbm [thread:$0]  %s70_s8, 128, %s206_s3, [#allocation5]  }
  0x3a   :  { %146 = dma.done.wait [#allocation5], 128  }
  0x3b   :  { %147 = vsyncadd [#allocation5], 4294967168 }
  0x3c   :  { %76 = vsyncpa [#allocation4], 1 }
  0x3d   :  { %77 = vsyncpa [#allocation5], 1 }
  0x3e   :  { %78 = vsyncpa [#allocation6], 1 }

</bundles_post_ra>
